<compile_context>
chip_gen: v7x
topology: tpu7x:2x2x1
jax: 0.10.0
libtpu: 0.0.40
codegen_flags: <defaults>
</compile_context>

<pallas_src>
import functools

import jax
import jax.numpy as jnp
from jax.experimental import pallas as pl
from jax.experimental.pallas import tpu as pltpu


# ---------------------------------------------------------------------------
# Fused kernel: the whole Conv->BN->ReLU chain in one invocation.
# ---------------------------------------------------------------------------
def _conv_block_kernel(*refs, n_layers, N, H, W, eps, activation):
    """refs = (x, [band_i, gamma_i, beta_i] * L, out)

    x      : (N*H, W*C0)          bf16, lane-dense activation slab
    band_i : (KH*W*Cin, W*Cout)   bf16, banded conv weights (KW taps + implicit
                                  W-axis zero-padding folded in by the wrapper)
    gamma_i, beta_i : (1, W*Cout) f32, BN affine params pre-tiled lane-dense
    out    : (N*H, W*C_last)      f32
    """
    x_ref = refs[0]
    o_ref = refs[1 + 3 * n_layers]

    cur = x_ref[...].astype(jnp.float32)                       # (N*H, W*C0)

    for li in range(n_layers):
        band_ref = refs[1 + 3 * li]
        g_ref = refs[2 + 3 * li]
        b_ref = refs[3 + 3 * li]

        KWCin, WCout = band_ref.shape
        WCin = cur.shape[-1]
        KH = KWCin // WCin
        Cout = WCout // W
        ph = KH // 2

        # ---- conv as ONE matmul: concatenate the KH row-shifted copies of the
        #      activation along the contraction axis, all in registers.  Only the
        #      |kh-ph| boundary rows per tap are zero-filled; the interior is the
        #      live activation, no VMEM round trip and no per-tap re-cast.
        cur3 = cur.reshape(N, H, WCin)
        taps = []
        for kh in range(KH):
            d = kh - ph
            if d < 0:
                t = jnp.concatenate(
                    [jnp.zeros((N, -d, WCin), cur3.dtype), cur3[:, :H + d, :]],
                    axis=1)
            elif d > 0:
                t = jnp.concatenate(
                    [cur3[:, d:, :], jnp.zeros((N, d, WCin), cur3.dtype)],
                    axis=1)
            else:
                t = cur3
            taps.append(t)
        xk = jnp.concatenate(taps, axis=2).reshape(N * H, KH * WCin)
        acc = jnp.dot(xk.astype(jnp.bfloat16), band_ref[...],
                      preferred_element_type=jnp.float32)       # (N*H, W*Cout) f32
        # (conv bias omitted: it cancels exactly under train-mode BN mean subtraction)

        # ---- BatchNorm (training-mode batch stats) + activation, lane-dense ----
        cnt = float(N * H * W)
        s1 = jnp.sum(acc, axis=0, keepdims=True)                # (1, W*Cout)
        s2 = jnp.sum(acc * acc, axis=0, keepdims=True)          # (1, W*Cout)
        s12 = jnp.concatenate([s1, s2], axis=0)                 # (2, W*Cout)
        # Fold the W lane-groups into per-channel totals with lane rolls; after
        # these steps EVERY Cout-wide group holds the totals, i.e. the result is
        # already lane-dense -> no broadcast-back concat is needed.
        if W & (W - 1) == 0:                                    # power of two: log2(W) steps
            sh = Cout
            while sh < W * Cout:
                s12 = s12 + pltpu.roll(s12, shift=sh, axis=1)
                sh *= 2
        else:                                                   # generic fallback: W-1 rolls
            rolled = s12
            for _ in range(W - 1):
                rolled = pltpu.roll(rolled, shift=Cout, axis=1)
                s12 = s12 + rolled
        mean = s12[0:1, :] / cnt
        # one-pass variance (E[x^2]-E[x]^2) in f32, clamped at 0; adequate at the
        # verified tolerance since conv outputs here are roughly zero-mean.
        var = jnp.maximum(s12[1:2, :] / cnt - mean * mean, 0.0)
        scale = g_ref[...] * jax.lax.rsqrt(var + eps)           # (1, W*Cout) lane-dense
        shift = b_ref[...] - mean * scale
        y = acc * scale + shift
        if activation == 'relu':
            y = jnp.maximum(y, 0.0)
        elif activation == 'relu6':
            y = jnp.clip(y, 0.0, 6.0)
        else:
            raise ValueError(activation)
        cur = y

    o_ref[...] = cur.astype(o_ref.dtype)


# ---------------------------------------------------------------------------
# Wrapper-side weight preparation: fold the KW taps and the implicit W-axis
# zero padding of a 'same' conv into a block-banded (KH*W*Cin, W*Cout) matrix
# (done once, outside the kernel).  The contraction-axis order is [kh][w][cin],
# matching the in-kernel tap concatenation.
# ---------------------------------------------------------------------------
def _banded_weights(w, W):
    KH, KW, Cin, Cout = w.shape
    pw = KW // 2
    j_in = jnp.arange(W)[:, None]
    j_out = jnp.arange(W)[None, :]
    kw_idx = j_in - j_out + pw                                  # (W_in, W_out)
    valid = (kw_idx >= 0) & (kw_idx < KW)
    kw_safe = jnp.clip(kw_idx, 0, KW - 1)
    band = w[:, kw_safe]                                        # (KH, Win, Wout, Cin, Cout)
    band = jnp.where(valid[None, :, :, None, None], band, 0.0)
    band = jnp.transpose(band, (0, 1, 3, 2, 4))                 # (KH, Win, Cin, Wout, Cout)
    return band.reshape(KH * W * Cin, W * Cout)
    # TODO(synk): for large W/C on v5e, switch to per-KW-tap matmuls with
    # pltpu.roll-shifted activations to avoid this banded form's ~(1-KW/W)
    # structural-zero FLOP inflation.


def _tile_bytes(shape, dtype):
    """(8,128)-tile-rounded VMEM footprint of one allocation."""
    item = jnp.dtype(dtype).itemsize
    if len(shape) == 0:
        return 512
    if len(shape) == 1:
        return max(512, (-(-(int(shape[0]) * item) // 512)) * 512)
    lead = 1
    for s in shape[:-2]:
        lead *= int(s)
    rows = (-(-int(shape[-2]) // 8)) * 8
    lanes = (-(-int(shape[-1]) // 128)) * 128
    return lead * rows * lanes * item


@functools.partial(jax.jit, static_argnames=("activation", "eps"))
def convolutional_block(x_nchw, params, *, activation='relu', eps=1e-5):
    N, C0, H, W = x_nchw.shape
    n_layers = len(params)
    dims = [C0] + [p[0].shape[-1] for p in params]
    kernels = [p[0].shape[0] for p in params]

    # NCHW -> lane-dense (N*H, W*C) bf16 slab (pure row-major reshape of NHWC)
    x_slab = jnp.transpose(x_nchw, (0, 2, 3, 1)).reshape(N * H, W * C0)
    x_slab = x_slab.astype(jnp.bfloat16)

    kernel_inputs = [x_slab]
    for (w, b, gamma, beta) in params:
        cout = w.shape[-1]
        # conv bias `b` is intentionally not passed: train-mode BatchNorm subtracts
        # the batch mean, which cancels any per-channel constant exactly.
        kernel_inputs += [
            _banded_weights(w, W).astype(jnp.bfloat16),
            jnp.tile(gamma.astype(jnp.float32), W).reshape(1, W * cout),
            jnp.tile(beta.astype(jnp.float32), W).reshape(1, W * cout),
        ]

    out_shape = jax.ShapeDtypeStruct((N * H, W * dims[-1]), jnp.float32)

    # ---- VMEM budget: tile-rounded resident footprint, clamped per-generation ----
    try:
        vmem_cap = int(pltpu.get_tpu_info().vmem_capacity_bytes)
    except Exception:
        vmem_cap = 64 * 2**20                                   # conservative (v7x)
    need = _tile_bytes(out_shape.shape, out_shape.dtype)
    for a in kernel_inputs:
        need += _tile_bytes(a.shape, a.dtype)
    for i, k in enumerate(kernels):                             # live register slabs
        need += _tile_bytes((N * H, k * W * dims[i]), jnp.float32)
        need += 2 * _tile_bytes((N * H, W * dims[i + 1]), jnp.float32)
    vmem_limit = int(min(max(2 * need, 16 * 2**20), max(vmem_cap // 2, 16 * 2**20)))

    # ---- cost estimate so XLA schedules the surrounding transposes sensibly ----
    flops = 0
    transcendentals = 0
    bytes_accessed = x_slab.size * x_slab.dtype.itemsize + N * H * W * dims[-1] * 4
    for i, k in enumerate(kernels):
        flops += 2 * (N * H) * (k * W * dims[i]) * (W * dims[i + 1])
        bytes_accessed += (k * W * dims[i]) * (W * dims[i + 1]) * 2 + 2 * 4 * W * dims[i + 1]
        transcendentals += W * dims[i + 1]
    cost = pl.CostEstimate(flops=flops, transcendentals=transcendentals,
                           bytes_accessed=bytes_accessed)

    kern = functools.partial(_conv_block_kernel, n_layers=n_layers,
                             N=N, H=H, W=W, eps=eps, activation=activation)
    # TODO(synk): for production sizes add a grid over N*H row blocks with
    # dimension_semantics=("parallel",) and a two-phase BN reduction so v7x's
    # second TensorCore is used; at this toy size a grid only adds overhead.
    out = pl.pallas_call(
        kern,
        out_shape=out_shape,
        in_specs=[pl.BlockSpec(memory_space=pltpu.MemorySpace.VMEM)
                  for _ in kernel_inputs],
        out_specs=pl.BlockSpec(memory_space=pltpu.MemorySpace.VMEM),
        compiler_params=pltpu.CompilerParams(vmem_limit_bytes=vmem_limit),
        cost_estimate=cost,
    )(*kernel_inputs)

    # (N*H, W*C_last) -> NHWC -> NCHW (match PyTorch output layout)
    return jnp.transpose(out.reshape(N, H, W, dims[-1]), (0, 3, 1, 2))


# ---------------------------------------------------------------------------
# Parameter init mirroring the PyTorch module's __init__.
# ---------------------------------------------------------------------------
def init_params(key, in_features, hidden_features, hidden_kernels):
    """conv weights: kaiming_uniform_(mode='fan_in', nonlinearity='relu'),
    conv bias: zeros, BN weight: ones, BN bias: zeros."""
    feats = [in_features] + list(hidden_features)
    params = []
    for i in range(1, len(feats)):
        cin, cout, k = feats[i - 1], feats[i], hidden_kernels[i - 1]
        key, wk = jax.random.split(key)
        fan_in = cin * k * k
        bound = (6.0 / fan_in) ** 0.5           # sqrt(3) * sqrt(2) / sqrt(fan_in)
        w_oihw = jax.random.uniform(wk, (cout, cin, k, k), jnp.float32, -bound, bound)
        w = jnp.transpose(w_oihw, (2, 3, 1, 0))  # -> (KH, KW, Cin, Cout)
        b = jnp.zeros((cout,), jnp.float32)
        gamma = jnp.ones((cout,), jnp.float32)
        beta = jnp.zeros((cout,), jnp.float32)
        params.append((w, b, gamma, beta))
    return params


# ---------------------------------------------------------------------------
# Pure-JAX reference (fp32) for a tolerance check.
# ---------------------------------------------------------------------------
def _reference(x_nchw, params, *, eps=1e-5, activation='relu'):
    x = x_nchw
    for (w, b, gamma, beta) in params:
        y = jax.lax.conv_general_dilated(
            x, w, window_strides=(1, 1), padding='SAME',
            dimension_numbers=('NCHW', 'HWIO', 'NCHW'))
        y = y + b[None, :, None, None]
        mean = jnp.mean(y, axis=(0, 2, 3), keepdims=True)
        var = jnp.mean((y - mean) ** 2, axis=(0, 2, 3), keepdims=True)
        y = (y - mean) * jax.lax.rsqrt(var + eps)
        y = y * gamma[None, :, None, None] + beta[None, :, None, None]
        y = jnp.maximum(y, 0.0) if activation == 'relu' else jnp.clip(y, 0.0, 6.0)
        x = y
    return x


if __name__ == "__main__":
    # ConvolutionalBlock(in_features=4, hidden_features=[8, 16],
    #                    hidden_kernels=[3, 3], activation='relu',
    #                    bn_args={}, act_args={})
    in_features = 4
    hidden_features = [8, 16]
    hidden_kernels = [3, 3]

    key = jax.random.PRNGKey(0)
    key, pkey, xkey = jax.random.split(key, 3)

    params = init_params(pkey, in_features, hidden_features, hidden_kernels)
    x = jax.random.normal(xkey, (2, in_features, 16, 16), jnp.float32)  # NCHW

    out = jax.block_until_ready(convolutional_block(x, params, activation='relu'))
    assert out.shape == (2, hidden_features[-1], 16, 16), out.shape

    # TODO(synk): PyTorch BatchNorm2d in training mode also updates
    # running_mean / running_var buffers; only the forward output is reproduced.
    ref = jax.block_until_ready(_reference(x, params, eps=1e-5, activation='relu'))
    err = float(jnp.max(jnp.abs(out - ref)))
    assert err < 0.1, f"max abs error vs reference: {err}"
    print("KERNEL_OK")
</pallas_src>

<mosaic_0001>
module attributes {stable_mosaic.version = 11 : i64} {
  func.func @_conv_block_kernel(%arg0: memref<32x64xbf16, #tpu.memory_space<vmem>>, %arg1: memref<192x128xbf16, #tpu.memory_space<vmem>>, %arg2: memref<1x128xf32, #tpu.memory_space<vmem>>, %arg3: memref<1x128xf32, #tpu.memory_space<vmem>>, %arg4: memref<384x256xbf16, #tpu.memory_space<vmem>>, %arg5: memref<1x256xf32, #tpu.memory_space<vmem>>, %arg6: memref<1x256xf32, #tpu.memory_space<vmem>>, %arg7: memref<32x256xf32, #tpu.memory_space<vmem>>) attributes {dimension_semantics = [], scalar_prefetch = 0 : i64, scratch_operands = 0 : i64, tpu.core_type = #tpu.core_type<tc>} {
    %c0 = arith.constant 0 : index
    %c0_0 = arith.constant 0 : index
    %0 = vector.load %arg0[%c0, %c0_0] : memref<32x64xbf16, #tpu.memory_space<vmem>>, vector<32x64xbf16>
    %1 = arith.extf %0 : vector<32x64xbf16> to vector<32x64xf32>
    %2 = vector.shape_cast %1 : vector<32x64xf32> to vector<2x16x64xf32>
    %cst = arith.constant 0.000000e+00 : f32
    %3 = vector.broadcast %cst : f32 to vector<2x1x64xf32>
    %4 = vector.extract_strided_slice %2 {offsets = [0, 0, 0], sizes = [2, 15, 64], strides = [1, 1, 1]} : vector<2x16x64xf32> to vector<2x15x64xf32>
    %5 = tpu.concatenate %3, %4 in 1 : vector<2x1x64xf32>, vector<2x15x64xf32> -> vector<2x16x64xf32>
    %6 = vector.extract_strided_slice %2 {offsets = [0, 1, 0], sizes = [2, 15, 64], strides = [1, 1, 1]} : vector<2x16x64xf32> to vector<2x15x64xf32>
    %cst_1 = arith.constant 0.000000e+00 : f32
    %7 = vector.broadcast %cst_1 : f32 to vector<2x1x64xf32>
    %8 = tpu.concatenate %6, %7 in 1 : vector<2x15x64xf32>, vector<2x1x64xf32> -> vector<2x16x64xf32>
    %9 = tpu.concatenate %5, %2, %8 in 2 : vector<2x16x64xf32>, vector<2x16x64xf32>, vector<2x16x64xf32> -> vector<2x16x192xf32>
    %10 = vector.shape_cast %9 : vector<2x16x192xf32> to vector<32x192xf32>
    %11 = arith.truncf %10 : vector<32x192xf32> to vector<32x192xbf16>
    %c0_2 = arith.constant 0 : index
    %c0_3 = arith.constant 0 : index
    %12 = vector.load %arg1[%c0_2, %c0_3] : memref<192x128xbf16, #tpu.memory_space<vmem>>, vector<192x128xbf16>
    %cst_4 = arith.constant dense<0.000000e+00> : vector<32x128xf32>
    %13 = tpu.matmul %11, %12, %cst_4 {dimension_numbers = #tpu.dot_dimension_numbers<[1], [0], [0], [1], [0, 0, 1, 1], [], []>} : vector<32x192xbf16>, vector<192x128xbf16>, vector<32x128xf32> -> vector<32x128xf32>
    %cst_5 = arith.constant dense<0.000000e+00> : vector<128xf32>
    %14 = vector.multi_reduction <add>, %13, %cst_5 [0] : vector<32x128xf32> to vector<128xf32>
    %15 = vector.shape_cast %14 : vector<128xf32> to vector<1x128xf32>
    %16 = arith.mulf %13, %13 : vector<32x128xf32>
    %cst_6 = arith.constant dense<0.000000e+00> : vector<128xf32>
    %17 = vector.multi_reduction <add>, %16, %cst_6 [0] : vector<32x128xf32> to vector<128xf32>
    %18 = vector.shape_cast %17 : vector<128xf32> to vector<1x128xf32>
    %19 = tpu.concatenate %15, %18 in 0 : vector<1x128xf32>, vector<1x128xf32> -> vector<2x128xf32>
    %c8_i32 = arith.constant 8 : i32
    %20 = tpu.dynamic_rotate %19 by %c8_i32 dim 1 : vector<2x128xf32>, i32 -> vector<2x128xf32>
    %21 = arith.addf %19, %20 : vector<2x128xf32>
    %c16_i32 = arith.constant 16 : i32
    %22 = tpu.dynamic_rotate %21 by %c16_i32 dim 1 : vector<2x128xf32>, i32 -> vector<2x128xf32>
    %23 = arith.addf %21, %22 : vector<2x128xf32>
    %c32_i32 = arith.constant 32 : i32
    %24 = tpu.dynamic_rotate %23 by %c32_i32 dim 1 : vector<2x128xf32>, i32 -> vector<2x128xf32>
    %25 = arith.addf %23, %24 : vector<2x128xf32>
    %c64_i32 = arith.constant 64 : i32
    %26 = tpu.dynamic_rotate %25 by %c64_i32 dim 1 : vector<2x128xf32>, i32 -> vector<2x128xf32>
    %27 = arith.addf %25, %26 : vector<2x128xf32>
    %28 = vector.extract_strided_slice %27 {offsets = [0, 0], sizes = [1, 128], strides = [1, 1]} : vector<2x128xf32> to vector<1x128xf32>
    %cst_7 = arith.constant 5.120000e+02 : f32
    %29 = vector.broadcast %cst_7 : f32 to vector<1x128xf32>
    %30 = arith.divf %28, %29 : vector<1x128xf32>
    %31 = vector.extract_strided_slice %27 {offsets = [1, 0], sizes = [1, 128], strides = [1, 1]} : vector<2x128xf32> to vector<1x128xf32>
    %cst_8 = arith.constant 5.120000e+02 : f32
    %32 = vector.broadcast %cst_8 : f32 to vector<1x128xf32>
    %33 = arith.divf %31, %32 : vector<1x128xf32>
    %34 = arith.mulf %30, %30 : vector<1x128xf32>
    %35 = arith.subf %33, %34 : vector<1x128xf32>
    %cst_9 = arith.constant 0.000000e+00 : f32
    %36 = vector.broadcast %cst_9 : f32 to vector<1x128xf32>
    %37 = arith.maximumf %35, %36 : vector<1x128xf32>
    %c0_10 = arith.constant 0 : index
    %c0_11 = arith.constant 0 : index
    %38 = vector.load %arg2[%c0_10, %c0_11] : memref<1x128xf32, #tpu.memory_space<vmem>>, vector<1x128xf32>
    %cst_12 = arith.constant 9.99999974E-6 : f32
    %39 = vector.broadcast %cst_12 : f32 to vector<1x128xf32>
    %40 = arith.addf %37, %39 : vector<1x128xf32>
    %41 = math.rsqrt %40 : vector<1x128xf32>
    %42 = arith.mulf %38, %41 : vector<1x128xf32>
    %c0_13 = arith.constant 0 : index
    %c0_14 = arith.constant 0 : index
    %43 = vector.load %arg3[%c0_13, %c0_14] : memref<1x128xf32, #tpu.memory_space<vmem>>, vector<1x128xf32>
    %44 = arith.mulf %30, %42 : vector<1x128xf32>
    %45 = arith.subf %43, %44 : vector<1x128xf32>
    %46 = vector.broadcast %42 : vector<1x128xf32> to vector<32x128xf32>
    %47 = arith.mulf %13, %46 : vector<32x128xf32>
    %48 = vector.broadcast %45 : vector<1x128xf32> to vector<32x128xf32>
    %49 = arith.addf %47, %48 : vector<32x128xf32>
    %cst_15 = arith.constant 0.000000e+00 : f32
    %50 = vector.broadcast %cst_15 : f32 to vector<32x128xf32>
    %51 = arith.maximumf %49, %50 : vector<32x128xf32>
    %52 = vector.shape_cast %51 : vector<32x128xf32> to vector<2x16x128xf32>
    %cst_16 = arith.constant 0.000000e+00 : f32
    %53 = vector.broadcast %cst_16 : f32 to vector<2x1x128xf32>
    %54 = vector.extract_strided_slice %52 {offsets = [0, 0, 0], sizes = [2, 15, 128], strides = [1, 1, 1]} : vector<2x16x128xf32> to vector<2x15x128xf32>
    %55 = tpu.concatenate %53, %54 in 1 : vector<2x1x128xf32>, vector<2x15x128xf32> -> vector<2x16x128xf32>
    %56 = vector.extract_strided_slice %52 {offsets = [0, 1, 0], sizes = [2, 15, 128], strides = [1, 1, 1]} : vector<2x16x128xf32> to vector<2x15x128xf32>
    %cst_17 = arith.constant 0.000000e+00 : f32
    %57 = vector.broadcast %cst_17 : f32 to vector<2x1x128xf32>
    %58 = tpu.concatenate %56, %57 in 1 : vector<2x15x128xf32>, vector<2x1x128xf32> -> vector<2x16x128xf32>
    %59 = tpu.concatenate %55, %52, %58 in 2 : vector<2x16x128xf32>, vector<2x16x128xf32>, vector<2x16x128xf32> -> vector<2x16x384xf32>
    %60 = vector.shape_cast %59 : vector<2x16x384xf32> to vector<32x384xf32>
    %61 = arith.truncf %60 : vector<32x384xf32> to vector<32x384xbf16>
    %c0_18 = arith.constant 0 : index
    %c0_19 = arith.constant 0 : index
    %62 = vector.load %arg4[%c0_18, %c0_19] : memref<384x256xbf16, #tpu.memory_space<vmem>>, vector<384x256xbf16>
    %cst_20 = arith.constant dense<0.000000e+00> : vector<32x256xf32>
    %63 = tpu.matmul %61, %62, %cst_20 {dimension_numbers = #tpu.dot_dimension_numbers<[1], [0], [0], [1], [0, 0, 1, 1], [], []>} : vector<32x384xbf16>, vector<384x256xbf16>, vector<32x256xf32> -> vector<32x256xf32>
    %cst_21 = arith.constant dense<0.000000e+00> : vector<256xf32>
    %64 = vector.multi_reduction <add>, %63, %cst_21 [0] : vector<32x256xf32> to vector<256xf32>
    %65 = vector.shape_cast %64 : vector<256xf32> to vector<1x256xf32>
    %66 = arith.mulf %63, %63 : vector<32x256xf32>
    %cst_22 = arith.constant dense<0.000000e+00> : vector<256xf32>
    %67 = vector.multi_reduction <add>, %66, %cst_22 [0] : vector<32x256xf32> to vector<256xf32>
    %68 = vector.shape_cast %67 : vector<256xf32> to vector<1x256xf32>
    %69 = tpu.concatenate %65, %68 in 0 : vector<1x256xf32>, vector<1x256xf32> -> vector<2x256xf32>
    %c16_i32_23 = arith.constant 16 : i32
    %70 = tpu.dynamic_rotate %69 by %c16_i32_23 dim 1 : vector<2x256xf32>, i32 -> vector<2x256xf32>
    %71 = arith.addf %69, %70 : vector<2x256xf32>
    %c32_i32_24 = arith.constant 32 : i32
    %72 = tpu.dynamic_rotate %71 by %c32_i32_24 dim 1 : vector<2x256xf32>, i32 -> vector<2x256xf32>
    %73 = arith.addf %71, %72 : vector<2x256xf32>
    %c64_i32_25 = arith.constant 64 : i32
    %74 = tpu.dynamic_rotate %73 by %c64_i32_25 dim 1 : vector<2x256xf32>, i32 -> vector<2x256xf32>
    %75 = arith.addf %73, %74 : vector<2x256xf32>
    %c128_i32 = arith.constant 128 : i32
    %76 = tpu.dynamic_rotate %75 by %c128_i32 dim 1 : vector<2x256xf32>, i32 -> vector<2x256xf32>
    %77 = arith.addf %75, %76 : vector<2x256xf32>
    %78 = vector.extract_strided_slice %77 {offsets = [0, 0], sizes = [1, 256], strides = [1, 1]} : vector<2x256xf32> to vector<1x256xf32>
    %cst_26 = arith.constant 5.120000e+02 : f32
    %79 = vector.broadcast %cst_26 : f32 to vector<1x256xf32>
    %80 = arith.divf %78, %79 : vector<1x256xf32>
    %81 = vector.extract_strided_slice %77 {offsets = [1, 0], sizes = [1, 256], strides = [1, 1]} : vector<2x256xf32> to vector<1x256xf32>
    %cst_27 = arith.constant 5.120000e+02 : f32
    %82 = vector.broadcast %cst_27 : f32 to vector<1x256xf32>
    %83 = arith.divf %81, %82 : vector<1x256xf32>
    %84 = arith.mulf %80, %80 : vector<1x256xf32>
    %85 = arith.subf %83, %84 : vector<1x256xf32>
    %cst_28 = arith.constant 0.000000e+00 : f32
    %86 = vector.broadcast %cst_28 : f32 to vector<1x256xf32>
    %87 = arith.maximumf %85, %86 : vector<1x256xf32>
    %c0_29 = arith.constant 0 : index
    %c0_30 = arith.constant 0 : index
    %88 = vector.load %arg5[%c0_29, %c0_30] : memref<1x256xf32, #tpu.memory_space<vmem>>, vector<1x256xf32>
    %cst_31 = arith.constant 9.99999974E-6 : f32
    %89 = vector.broadcast %cst_31 : f32 to vector<1x256xf32>
    %90 = arith.addf %87, %89 : vector<1x256xf32>
    %91 = math.rsqrt %90 : vector<1x256xf32>
    %92 = arith.mulf %88, %91 : vector<1x256xf32>
    %c0_32 = arith.constant 0 : index
    %c0_33 = arith.constant 0 : index
    %93 = vector.load %arg6[%c0_32, %c0_33] : memref<1x256xf32, #tpu.memory_space<vmem>>, vector<1x256xf32>
    %94 = arith.mulf %80, %92 : vector<1x256xf32>
    %95 = arith.subf %93, %94 : vector<1x256xf32>
    %96 = vector.broadcast %92 : vector<1x256xf32> to vector<32x256xf32>
    %97 = arith.mulf %63, %96 : vector<32x256xf32>
    %98 = vector.broadcast %95 : vector<1x256xf32> to vector<32x256xf32>
    %99 = arith.addf %97, %98 : vector<32x256xf32>
    %cst_34 = arith.constant 0.000000e+00 : f32
    %100 = vector.broadcast %cst_34 : f32 to vector<32x256xf32>
    %101 = arith.maximumf %99, %100 : vector<32x256xf32>
    %c0_35 = arith.constant 0 : index
    %c0_36 = arith.constant 0 : index
    %102 = vector.load %arg7[%c0_35, %c0_36] : memref<32x256xf32, #tpu.memory_space<vmem>>, vector<32x256xf32>
    tpu.vector_store %arg7[%c0_35, %c0_36], %101 {strides = array<i32>} : memref<32x256xf32, #tpu.memory_space<vmem>>, vector<32x256xf32>,
    return
  }
}

</mosaic_0001>

<bundles_post_ra>
// kernel: tile.33
= control target key start
LH: loop header
LB: loop body
LE: loop exit
PB: predicated region body
PF: predicated region fallthrough
CT: control target
= control target key end

     0   :  { %s28_s0 = inlined_call_operand.vmem [shape: f32[16], index: 0, kind: input, shape index: {}]   ;;  %s29_s1 = inlined_call_operand.vmem [shape: f32[16,16], index: 1, kind: output, shape index: {}]  }
   0x1   :  { %v4_v0 = vld [vmem:[%s28_s0] ss:$0 sm:$0xff] }
   0x2   :  { %5 = vst [vmem:[%s29_s1] sm:$0xff] %v4_v0  ;;  %8 = vst [vmem:[%s29_s1 + $0x8] sm:$0xff] %v4_v0 }

// kernel: tile.34
= control target key start
LH: loop header
LB: loop body
LE: loop exit
PB: predicated region body
PF: predicated region fallthrough
CT: control target
= control target key end

     0   :  { %s7_s6 = smov 3  ;;  %s21_s9 = smov 3  ;;  %vm4_vm0 = vcmask 130048   ;;  %vm11_vm1 = vcmask 1048448   ;;  %vm18_vm2 = vcmask 917248   ;;  %vm25_vm3 = vcmask 786048   ;;  %s128_s0 = inlined_call_operand.vmem [shape: f32[16,16], index: 0, kind: input, shape index: {}]   ;;  %s129_s1 = inlined_call_operand.vmem [shape: f32[1,256], index: 1, kind: output, shape index: {}]  }
   0x1   :  { %v66_v0 = vld [vmem:[%s128_s0 + $0x7] ss:$8 sm:%s7_s6]   ;;  %s81_s10 = smov 112   ;;  %v68_v1 = vld [vmem:[%s128_s0 + $0x5] ss:$8 sm:%s21_s9]   ;;  %s14_s13 = smov 3 }
   0x2   :  { %9 = vrot.lane.b32.xlu0 %v66_v0, %s81_s10  ;;  %s82_s14 = smov 80   ;;  %v67_v2 = vld [vmem:[%s128_s0 + $0x6] ss:$8 sm:%s14_s13]   ;;  %s28_s17 = smov 3  ;;  %vm32_vm4 = vcmask 654848   ;;  %vm39_vm5 = vcmask 523648  }
   0x3   :  { %23 = vrot.lane.b32.xlu1 %v68_v1, %s82_s14  ;;  %v69_v3 = vld [vmem:[%s128_s0 + $0x4] ss:$8 sm:%s28_s17]   ;;  %s35_s20 = smov 3  ;;  %s42_s21 = smov 3  ;;  %vm46_vm6 = vcmask 392448   ;;  %vm53_vm7 = vcmask 261248  }
   0x4   :  { %s83_s22 = smov 96   ;;  %s84_s23 = smov 64   ;;  %v70_v4 = vld [vmem:[%s128_s0 + $0x3] ss:$8 sm:%s35_s20]   ;;  %v71_v5 = vld [vmem:[%s128_s0 + $0x2] ss:$8 sm:%s42_s21]  }
   0x5   :  { %s2_s26 = smov 3  ;;  %s49_s29 = smov 3 }
   0x6   :  { %16 = vrot.lane.b32.xlu0 %v67_v2, %s83_s22  ;;  %v3_v6 = vld [vmem:[%s128_s0] ss:$8 sm:%s2_s26]   ;;  %s85_s3 = smov 48   ;;  %s86_s4 = smov 32  }
   0x7   :  { %30 = vrot.lane.b32.xlu1 %v69_v3, %s84_s23  ;;  %5 = vst.msk [vmem:[#allocation0] ss:$8 sm:$0x3] %vm4_vm0, %v3_v6   ;;  %v72_v7 = vld [vmem:[%s128_s0 + $0x1] ss:$8 sm:%s49_s29]   ;;  %s87_s0 = smov 16  }
   0xa   :  { %37 = vrot.lane.b32.xlu0 %v70_v4, %s85_s3 }
   0xb   :  { %44 = vrot.lane.b32.xlu1 %v71_v5, %s86_s4 }
   0xe   :  { %51 = vrot.lane.b32.xlu0 %v72_v7, %s87_s0 }
  0x74   :  { %v10_v8 = vpop.permute.xlu0 %9  }
  0x75   :  { %12 = vst.msk [vmem:[#allocation0] ss:$8 sm:$0x3] %vm11_vm1, %v10_v8   ;;  %v24_v9 = vpop.permute.xlu1 %23  }
  0x78   :  { %v17_v10 = vpop.permute.xlu0 %16  }
  0x79   :  { %19 = vst.msk [vmem:[#allocation0] ss:$8 sm:$0x3] %vm18_vm2, %v17_v10   ;;  %v31_v11 = vpop.permute.xlu1 %30  }
  0x7a   :  { %26 = vst.msk [vmem:[#allocation0] ss:$8 sm:$0x3] %vm25_vm3, %v24_v9  }
  0x7b   :  { %33 = vst.msk [vmem:[#allocation0] ss:$8 sm:$0x3] %vm32_vm4, %v31_v11  }
  0x7c   :  { %v38_v12 = vpop.permute.xlu0 %37  }
  0x7d   :  { %40 = vst.msk [vmem:[#allocation0] ss:$8 sm:$0x3] %vm39_vm5, %v38_v12   ;;  %v45_v13 = vpop.permute.xlu1 %44  }
  0x7e   :  { %47 = vst.msk [vmem:[#allocation0] ss:$8 sm:$0x3] %vm46_vm6, %v45_v13  }
  0x80   :  { %v52_v14 = vpop.permute.xlu0 %51  }
  0x81   :  { %54 = vst.msk [vmem:[#allocation0] ss:$8 sm:$0x3] %vm53_vm7, %v52_v14  }
  0x88   :  { %v58_v15 = vld [vmem:[#allocation0] sm:$0x1]  ;;  %v62_v16 = vld [vmem:[#allocation0 + $0x8] sm:$0x1] }
  0x89   :  { %60 = vst [vmem:[%s129_s1] sm:$0x1] %v58_v15  ;;  %73 = vst [vmem:[%s129_s1 + $0x1] sm:$0x1] %v62_v16 }

// kernel: tile.23
= control target key start
LH: loop header
LB: loop body
LE: loop exit
PB: predicated region body
PF: predicated region fallthrough
CT: control target
= control target key end

     0   :  { %s28_s0 = inlined_call_operand.vmem [shape: f32[8], index: 0, kind: input, shape index: {}]   ;;  %s29_s1 = inlined_call_operand.vmem [shape: f32[16,8], index: 1, kind: output, shape index: {}]  }
   0x1   :  { %v4_v0 = vld [vmem:[%s28_s0] ss:$0 sm:$0xff] }
   0x2   :  { %5 = vst [vmem:[%s29_s1] sm:$0xff] %v4_v0  ;;  %8 = vst [vmem:[%s29_s1 + $0x8] sm:$0xff] %v4_v0 }

// kernel: tile.24
= control target key start
LH: loop header
LB: loop body
LE: loop exit
PB: predicated region body
PF: predicated region fallthrough
CT: control target
= control target key end

     0   :  { %s131_s10 = smov 120   ;;  %s132_s11 = smov 104   ;;  %vm3_vm0 = vcmask 64512   ;;  %vm9_vm1 = vcmask 1048512   ;;  %vm15_vm2 = vcmask 982912   ;;  %vm21_vm3 = vcmask 917312   ;;  %s207_s0 = inlined_call_operand.vmem [shape: f32[16,8], index: 0, kind: input, shape index: {}]   ;;  %s208_s1 = inlined_call_operand.vmem [shape: f32[1,128], index: 1, kind: output, shape index: {}]  }
   0x1   :  { %v101_v0 = vld [vmem:[%s207_s0 + $0xf] sm:$0x1]   ;;  %v103_v1 = vld [vmem:[%s207_s0 + $0xd] sm:$0x1]   ;;  %v102_v2 = vld [vmem:[%s207_s0 + $0xe] sm:$0x1]  }
   0x2   :  { %7 = vrot.lane.b32.xlu0 %v101_v0, %s131_s10  ;;  %19 = vrot.lane.b32.xlu1 %v103_v1, %s132_s11  ;;  %v104_v3 = vld [vmem:[%s207_s0 + $0xc] sm:$0x1]   ;;  %s133_s16 = smov 112   ;;  %s134_s17 = smov 96   ;;  %v105_v4 = vld [vmem:[%s207_s0 + $0xb] sm:$0x1]  }
   0x3   :  { %v106_v5 = vld [vmem:[%s207_s0 + $0xa] sm:$0x1]   ;;  %v2_v6 = vld [vmem:[%s207_s0] sm:$0x1]   ;;  %s135_s24 = smov 88   ;;  %s136_s25 = smov 80  }
   0x4   :  { %4 = vst.msk [vmem:[#allocation0] sm:$0x1] %vm3_vm0, %v2_v6   ;;  %v107_v7 = vld [vmem:[%s207_s0 + $0x9] sm:$0x1]   ;;  %v108_v8 = vld [vmem:[%s207_s0 + $0x8] sm:$0x1]  }
   0x5   :  { %s137_s30 = smov 72   ;;  %s138_s2 = smov 64   ;;  %v109_v9 = vld [vmem:[%s207_s0 + $0x7] sm:$0x1]   ;;  %v110_v10 = vld [vmem:[%s207_s0 + $0x6] sm:$0x1]  }
   0x6   :  { %13 = vrot.lane.b32.xlu0 %v102_v2, %s133_s16  ;;  %25 = vrot.lane.b32.xlu1 %v104_v3, %s134_s17  ;;  %s139_s7 = smov 56   ;;  %s140_s8 = smov 48   ;;  %v111_v11 = vld [vmem:[%s207_s0 + $0x5] sm:$0x1]   ;;  %v112_v12 = vld [vmem:[%s207_s0 + $0x4] sm:$0x1]  }
   0x7   :  { %s141_s13 = smov 40   ;;  %s142_s14 = smov 32   ;;  %v113_v13 = vld [vmem:[%s207_s0 + $0x3] sm:$0x1]   ;;  %v114_v14 = vld [vmem:[%s207_s0 + $0x2] sm:$0x1]  }
   0x8   :  { %s143_s19 = smov 24   ;;  %s144_s20 = smov 16   ;;  %v115_v15 = vld [vmem:[%s207_s0 + $0x1] sm:$0x1]   ;;  %vm27_vm4 = vcmask 851712   ;;  %vm33_vm5 = vcmask 786112  }
   0x9   :  { %s145_s0 = smov 8   ;;  %vm39_vm6 = vcmask 720512   ;;  %vm45_vm7 = vcmask 654912   ;;  %vm51_vm8 = vcmask 589312   ;;  %vm57_vm9 = vcmask 523712  }
   0xa   :  { %31 = vrot.lane.b32.xlu0 %v105_v4, %s135_s24  ;;  %37 = vrot.lane.b32.xlu1 %v106_v5, %s136_s25  ;;  %vm63_vm10 = vcmask 458112   ;;  %vm69_vm11 = vcmask 392512   ;;  %vm75_vm12 = vcmask 326912   ;;  %vm81_vm13 = vcmask 261312  }
   0xb   :  { %vm87_vm14 = vcmask 195712   ;;  %vm93_vm15 = vcmask 130112  }
   0xe   :  { %43 = vrot.lane.b32.xlu0 %v107_v7, %s137_s30  ;;  %49 = vrot.lane.b32.xlu1 %v108_v8, %s138_s2 }
  0x12   :  { %55 = vrot.lane.b32.xlu0 %v109_v9, %s139_s7  ;;  %61 = vrot.lane.b32.xlu1 %v110_v10, %s140_s8 }
  0x16   :  { %67 = vrot.lane.b32.xlu0 %v111_v11, %s141_s13  ;;  %73 = vrot.lane.b32.xlu1 %v112_v12, %s142_s14 }
  0x1a   :  { %79 = vrot.lane.b32.xlu0 %v113_v13, %s143_s19  ;;  %85 = vrot.lane.b32.xlu1 %v114_v14, %s144_s20 }
  0x1e   :  { %91 = vrot.lane.b32.xlu0 %v115_v15, %s145_s0 }
  0x74   :  { %v8_v16 = vpop.permute.xlu0 %7   ;;  %v20_v17 = vpop.permute.xlu1 %19  }
  0x75   :  { %10 = vst.msk [vmem:[#allocation0] sm:$0x1] %vm9_vm1, %v8_v16  }
  0x78   :  { %v14_v18 = vpop.permute.xlu0 %13   ;;  %v26_v19 = vpop.permute.xlu1 %25  }
  0x79   :  { %16 = vst.msk [vmem:[#allocation0] sm:$0x1] %vm15_vm2, %v14_v18  }
  0x7a   :  { %22 = vst.msk [vmem:[#allocation0] sm:$0x1] %vm21_vm3, %v20_v17  }
  0x7b   :  { %28 = vst.msk [vmem:[#allocation0] sm:$0x1] %vm27_vm4, %v26_v19  }
  0x7c   :  { %v32_v20 = vpop.permute.xlu0 %31   ;;  %v38_v21 = vpop.permute.xlu1 %37  }
  0x7d   :  { %34 = vst.msk [vmem:[#allocation0] sm:$0x1] %vm33_vm5, %v32_v20  }
  0x7e   :  { %40 = vst.msk [vmem:[#allocation0] sm:$0x1] %vm39_vm6, %v38_v21  }
  0x80   :  { %v44_v22 = vpop.permute.xlu0 %43   ;;  %v50_v23 = vpop.permute.xlu1 %49  }
  0x81   :  { %46 = vst.msk [vmem:[#allocation0] sm:$0x1] %vm45_vm7, %v44_v22  }
  0x82   :  { %52 = vst.msk [vmem:[#allocation0] sm:$0x1] %vm51_vm8, %v50_v23  }
  0x84   :  { %v56_v24 = vpop.permute.xlu0 %55   ;;  %v62_v25 = vpop.permute.xlu1 %61  }
  0x85   :  { %58 = vst.msk [vmem:[#allocation0] sm:$0x1] %vm57_vm9, %v56_v24  }
  0x86   :  { %64 = vst.msk [vmem:[#allocation0] sm:$0x1] %vm63_vm10, %v62_v25  }
  0x88   :  { %v68_v26 = vpop.permute.xlu0 %67   ;;  %v74_v27 = vpop.permute.xlu1 %73  }
  0x89   :  { %70 = vst.msk [vmem:[#allocation0] sm:$0x1] %vm69_vm11, %v68_v26  }
  0x8a   :  { %76 = vst.msk [vmem:[#allocation0] sm:$0x1] %vm75_vm12, %v74_v27  }
  0x8c   :  { %v80_v28 = vpop.permute.xlu0 %79   ;;  %v86_v29 = vpop.permute.xlu1 %85  }
  0x8d   :  { %82 = vst.msk [vmem:[#allocation0] sm:$0x1] %vm81_vm13, %v80_v28  }
  0x8e   :  { %88 = vst.msk [vmem:[#allocation0] sm:$0x1] %vm87_vm14, %v86_v29  }
  0x90   :  { %v92_v30 = vpop.permute.xlu0 %91  }
  0x91   :  { %94 = vst.msk [vmem:[#allocation0] sm:$0x1] %vm93_vm15, %v92_v30  }
  0x98   :  { %v98_v31 = vld [vmem:[#allocation0] sm:$0x1] }
  0x99   :  { %100 = vst [vmem:[%s208_s1] sm:$0x1] %v98_v31 }

// kernel: convolutional_block.1
= control target key start
LH: loop header
LB: loop body
LE: loop exit
PB: predicated region body
PF: predicated region fallthrough
CT: control target
= control target key end

     0   :  { %v1139_v2 = vmov 0   ;;  %vm52_vm0 = vcmask 1046528   ;;  %vm39_vm1 = vcmask 1040384   ;;  %vm77_vm2 = vcmask 523264   ;;  %s1142_s29 = smov 16   ;;  %s1143_s23 = smov 32   ;;  %s1571_s0 = inlined_call_operand.vmem [shape: bf16[32,64], index: 0, kind: input, shape index: {}]   ;;  %s1572_s1 = inlined_call_operand.vmem [shape: bf16[192,128], index: 1, kind: input, shape index: {}]   ;;  %s1573_s4 = inlined_call_operand.vmem [shape: bf16[384,256], index: 4, kind: input, shape index: {}]   ;;  %s1574_s2 = inlined_call_operand.vmem [shape: f32[1,128], index: 2, kind: input, shape index: {}]   ;;  %s1575_s3 = inlined_call_operand.vmem [shape: f32[1,128], index: 3, kind: input, shape index: {}]   ;;  %s1576_s5 = inlined_call_operand.vmem [shape: f32[1,256], index: 5, kind: input, shape index: {}]   ;;  %s1577_s6 = inlined_call_operand.vmem [shape: f32[1,256], index: 6, kind: input, shape index: {}]   ;;  %s1578_s7 = inlined_call_operand.vmem [shape: f32[32,256], index: 7, kind: output, shape index: {}]  }
   0x1   :  { %v1018_v0 = vld [vmem:[%s1571_s0] sm:$0xff]   ;;  %v1025_v1 = vld [vmem:[%s1571_s0 + $0x8] sm:$0xff]   ;;  %188 = vmatprep.subr.bf16.mxu0 %v1139_v2  ;;  %s1140_s0 = smov 64   ;;  %v1053_v15 = vld [vmem:[%s1572_s1 + $0x10] sm:$0xff]   ;;  %vm1145_vm4 = vmmov 1  }
   0x2   :  { %v1193_v3 = vunpack.c.l.bf16 %v1018_v0  ;;  %v1020_v4 = vunpack.c.h.bf16 %v1018_v0  ;;  %v1195_v5 = vunpack.c.l.bf16 %v1025_v1  ;;  %v1024_v6 = vunpack.c.h.bf16 %v1025_v1  ;;  %v1051_v7 = vld [vmem:[%s1572_s1] sm:$0xff]   ;;  %v1052_v9 = vld [vmem:[%s1572_s1 + $0x8] sm:$0xff]   ;;  %v1054_v22 = vld [vmem:[%s1572_s1 + $0x18] sm:$0xff]  }
   0x3   :  { %189 = vmatpush1.bf16.msra.mxu0 %v1051_v7  ;;  %v1055_v29 = vld [vmem:[%s1572_s1 + $0x20] sm:$0xff]   ;;  %v1056_v30 = vld [vmem:[%s1572_s1 + $0x28] sm:$0xff]   ;;  %v1057_v31 = vld [vmem:[%s1572_s1 + $0x30] sm:$0xff]  }
   0x4   :  { %v1041_v8 = vpack.i.bf16 %v1020_v4, %v1193_v3  ;;  %v41_v10 = vrot.slane %v1020_v4, 7  ;;  %190 = vmatprep.subr.bf16.mxu0 %v1139_v2  ;;  %v53_v11 = vrot.slane %v1193_v3, 1  ;;  %v1046_v12 = vpack.i.bf16 %v1024_v6, %v1195_v5  ;;  %v1058_v32 = vld [vmem:[%s1572_s1 + $0x38] sm:$0xff]   ;;  %v1059_v33 = vld [vmem:[%s1572_s1 + $0x40] sm:$0xff]   ;;  %v1060_v34 = vld [vmem:[%s1572_s1 + $0x48] sm:$0xff]  }
   0x5   :  { %v54_v13 = vrot.slane %v1020_v4, 1  ;;  %v40_v14 = vrot.slane %v1193_v3, 7  ;;  %v56_v20 = vrot.slane %v1195_v5, 1  ;;  %v57_v21 = vrot.slane %v1024_v6, 1  ;;  %v1061_v35 = vld [vmem:[%s1572_s1 + $0x50] sm:$0xff]   ;;  %v1062_v36 = vld [vmem:[%s1572_s1 + $0x58] sm:$0xff]   ;;  %vm1003_vm3 = vmneg %vm39_vm1 }
   0x6   :  { %1042 = vrot.lane.b32.xlu0 %v1041_v8, %s1140_s0  ;;  %v43_v23 = vrot.slane %v1195_v5, 7  ;;  %v44_v26 = vrot.slane %v1024_v6, 7  ;;  %s1141_s1 = smov 8   ;;  %vm1463_vm5 = vmpackc.low %vm1145_vm4, %vm1003_vm3 }
   0x7   :  { %191 = vmatpush1.bf16.msra.mxu0 %v1052_v9  ;;  %v55_v16 = vsel %vm52_vm0, %v53_v11, %v54_v13  ;;  %v63_v17 = vsel %vm52_vm0, %v54_v13, 0.0  ;;  %v42_v19 = vsel %vm39_vm1, %v40_v14, %v41_v10  ;;  %v58_v24 = vsel %vm52_vm0, %v56_v20, %v57_v21  ;;  %vm1011_vm6 = vmpackc.low %vm52_vm0, %vm1145_vm4 }
   0x8   :  { %192 = vmatprep.subr.bf16.mxu0 %v1139_v2  ;;  %v83_v18 = vpack.c.bf16 %v63_v17, %v55_v16  ;;  %v64_v25 = vsel %vm52_vm0, %v57_v21, 0.0  ;;  %v45_v28 = vsel %vm39_vm1, %v43_v23, %v44_v26  ;;  %v50_v38 = vsel %vm39_vm1, 0.0, %v40_v14  ;;  %v1063_v21 = vld [vmem:[%s1573_s4 + $0x4] ss:$8 sps:$4 sm:$0xff]   ;;  %v1071_v26 = vld [vmem:[%s1573_s4 + $0x20] ss:$8 sps:$4 sm:$0xff]  }
   0x9   :  { %v85_v27 = vpack.c.bf16 %v64_v25, %v58_v24  ;;  %v51_v45 = vsel %vm39_vm1, 0.0, %v43_v23  ;;  %650 = vmatprep.subr.bf16.mxu1 %v1063_v21  ;;  %v1066_v23 = vld [vmem:[%s1573_s4 + $0x14] ss:$8 sps:$4 sm:$0xff]   ;;  %v1068_v24 = vld [vmem:[%s1573_s4 + $0x10] ss:$8 sps:$4 sm:$0xff]  }
   0xa   :  { %1047 = vrot.lane.b32.xlu0 %v1046_v12, %s1140_s0  ;;  %953 = vmatprep.mubr.msk.bf16.mxu0 %vm77_vm2, %v83_v18  ;;  %v1069_v25 = vld [vmem:[%s1573_s4 + $0x24] ss:$8 sps:$4 sm:$0xff]  }
   0xb   :  { %193 = vmatpush1.bf16.msra.mxu0 %v1053_v15 }
   0xc   :  { %194 = vmatprep.subr.bf16.mxu0 %v1139_v2 }
   0xf   :  { %195 = vmatpush1.bf16.msra.mxu0 %v1054_v22  ;;  %v1065_v22 = vld [vmem:[%s1573_s4] ss:$8 sps:$4 sm:$0xff]  }
  0x10   :  { %196 = vmatprep.subr.bf16.mxu0 %v1139_v2  ;;  %651 = vmatpush1.bf16.msra.mxu1 %v1065_v22  ;;  %v1144_v22 = vmov 1966171168  }
  0x11   :  { %652 = vmatprep.subr.bf16.mxu1 %v1066_v23  ;;  %v285_v23 = vunpack.c.l.s4 %v1144_v22 }
  0x13   :  { %197 = vmatpush1.bf16.msra.mxu0 %v1055_v29 }
  0x14   :  { %198 = vmatprep.subr.bf16.mxu0 %v1139_v2  ;;  %653 = vmatpush1.bf16.msra.mxu1 %v1068_v24  ;;  %v287_v24 = vlaneseq }
  0x15   :  { %654 = vmatprep.subr.bf16.mxu1 %v1069_v25  ;;  %v286_v25 = vunpack.c.0.s8 %v285_v23 }
  0x17   :  { %199 = vmatpush1.bf16.msra.mxu0 %v1056_v30  ;;  %v1074_v30 = vld [vmem:[%s1573_s4 + $0x30] ss:$8 sps:$4 sm:$0xff]  }
  0x18   :  { %200 = vmatprep.subr.bf16.mxu0 %v1139_v2  ;;  %655 = vmatpush1.bf16.msra.mxu1 %v1071_v26  ;;  %v1440_v26 = vshrl.u32 %v287_v24, 7 }
  0x1b   :  { %201 = vmatpush1.bf16.msra.mxu0 %v1057_v31  ;;  %v1075_v31 = vld [vmem:[%s1573_s4 + $0x44] ss:$8 sps:$4 sm:$0xff]  }
  0x1c   :  { %202 = vmatprep.subr.bf16.mxu0 %v1139_v2 }
  0x1f   :  { %203 = vmatpush1.bf16.msra.mxu0 %v1058_v32  ;;  %v1077_v32 = vld [vmem:[%s1573_s4 + $0x40] ss:$8 sps:$4 sm:$0xff]  }
  0x20   :  { %204 = vmatprep.subr.bf16.mxu0 %v1139_v2 }
  0x23   :  { %205 = vmatpush1.bf16.msra.mxu0 %v1059_v33  ;;  %v1078_v33 = vld [vmem:[%s1573_s4 + $0x54] ss:$8 sps:$4 sm:$0xff]  }
  0x24   :  { %206 = vmatprep.subr.bf16.mxu0 %v1139_v2 }
  0x27   :  { %207 = vmatpush1.bf16.msra.mxu0 %v1060_v34  ;;  %v1080_v34 = vld [vmem:[%s1573_s4 + $0x50] ss:$8 sps:$4 sm:$0xff]  }
  0x28   :  { %208 = vmatprep.subr.bf16.mxu0 %v1139_v2 }
  0x2b   :  { %209 = vmatpush1.bf16.msra.mxu0 %v1061_v35  ;;  %v1081_v35 = vld [vmem:[%s1573_s4 + $0x64] ss:$8 sps:$4 sm:$0xff]  }
  0x2c   :  { %210 = vmatprep.subr.bf16.mxu0 %v1139_v2 }
  0x2f   :  { %211 = vmatpush1.bf16.msra.mxu0 %v1062_v36  ;;  %v1083_v36 = vld [vmem:[%s1573_s4 + $0x60] ss:$8 sps:$4 sm:$0xff]  }
  0x78   :  { %v1043_v37 = vpop.permute.xlu0 %1042 }
  0x79   :  { %v1045_v39 = vunpack.i.h.bf16 %v1043_v37  ;;  %v1044_v40 = vunpack.i.l.bf16 %v1043_v37 }
  0x7b   :  { %v78_v41 = vsel %vm77_vm2, %v50_v38, %v1044_v40  ;;  %v79_v42 = vsel %vm77_vm2, %v42_v19, %v1045_v39  ;;  %v1084_v38 = vld [vmem:[%s1573_s4 + $0x74] ss:$8 sps:$4 sm:$0xff]   ;;  %v1086_v40 = vld [vmem:[%s1573_s4 + $0x70] ss:$8 sps:$4 sm:$0xff]  }
  0x7c   :  { %v82_v43 = vpack.c.bf16 %v79_v42, %v78_v41  ;;  %v1048_v44 = vpop.permute.xlu0 %1047  ;;  %v1087_v41 = vld [vmem:[%s1573_s4 + $0x84] ss:$8 sps:$4 sm:$0xff]  }
  0x7d   :  { %v1050_v46 = vunpack.i.h.bf16 %v1048_v44  ;;  %v1049_v47 = vunpack.i.l.bf16 %v1048_v44  ;;  %v1091_v42 = vld [vmem:[%s1573_s4 + $0x104] ss:$8 sps:$4 sm:$0xff]   ;;  %v1092_v44 = vld [vmem:[%s1573_s4 + $0x80] ss:$8 sps:$4 sm:$0xff]  }
  0x7e   :  { %221 = vmatmul.mubr.bf16.vlgmr.msra.gmra.mrb[0].mxu0 %v82_v43  ;;  %v1089_v43 = vld [vmem:[%s1573_s4 + $0x100] ss:$8 sps:$4 sm:$0xff]   ;;  %703 = vmatprep.subr.bf16.mxu0 %v1091_v42 }
  0x7f   :  { %954 = vmatprep.mubr.msk.bf16.mxu0 %vm77_vm2, %v85_v27  ;;  %v80_v48 = vsel %vm77_vm2, %v51_v45, %v1049_v47  ;;  %v81_v49 = vsel %vm77_vm2, %v45_v28, %v1050_v46  ;;  %v1072_v27 = vld [vmem:[%s1573_s4 + $0x34] ss:$8 sps:$4 sm:$0xff]   ;;  %704 = vmatpush1.bf16.msra.mxu0 %v1089_v43  ;;  %v1095_v47 = vld [vmem:[%s1573_s4 + $0x110] ss:$8 sps:$4 sm:$0xff]  }
  0x80   :  { %v84_v50 = vpack.c.bf16 %v81_v49, %v80_v48  ;;  %656 = vmatprep.subr.bf16.mxu1 %v1072_v27  ;;  %v1093_v45 = vld [vmem:[%s1573_s4 + $0x94] ss:$8 sps:$4 sm:$0xff]   ;;  %v1098_v48 = vld [vmem:[%s1573_s4 + $0x90] ss:$8 sps:$4 sm:$0xff]   ;;  %v1099_v49 = vld [vmem:[%s1573_s4 + $0xa4] ss:$8 sps:$4 sm:$0xff]   ;;  %v1443_v27 = vsub.s32 %v286_v25, %v1440_v26 }
  0x81   :  { %657 = vmatpush1.bf16.msra.mxu1 %v1074_v30  ;;  %v1097_v46 = vld [vmem:[%s1573_s4 + $0x114] ss:$8 sps:$4 sm:$0xff]  }
  0x82   :  { %658 = vmatprep.subr.bf16.mxu1 %v1075_v31  ;;  %705 = vmatprep.subr.bf16.mxu0 %v1097_v46  ;;  %v280_v31 = vld [vmem:[%s1574_s2] sm:$0x1] }
  0x83   :  { %706 = vmatpush1.bf16.msra.mxu0 %v1095_v47 }
  0x85   :  { %659 = vmatpush1.bf16.msra.mxu1 %v1077_v32  ;;  %v1450_v32 = vsub.s32 0, %v1440_v26 }
  0x86   :  { %229 = vmatmul.mubr.bf16.gmra.mrb[4].mxu0 %v84_v50  ;;  %660 = vmatprep.subr.bf16.mxu1 %v1078_v33  ;;  %v1103_v50 = vld [vmem:[%s1573_s4 + $0x124] ss:$8 sps:$4 sm:$0xff]  }
  0x87   :  { %735 = vmatprep.mubr.bf16.mxu0 %v1139_v2  ;;  %707 = vmatprep.subr.bf16.mxu0 %v1103_v50 }
  0x89   :  { %661 = vmatpush1.bf16.msra.mxu1 %v1080_v34 }
  0x8a   :  { %662 = vmatprep.subr.bf16.mxu1 %v1081_v35  ;;  %v301_v35 = vld [vmem:[%s1575_s3] sm:$0x1] }
  0x8d   :  { %663 = vmatpush1.bf16.msra.mxu1 %v1083_v36 }
  0x8e   :  { %664 = vmatprep.subr.bf16.mxu1 %v1084_v38 }
  0x91   :  { %665 = vmatpush1.bf16.msra.mxu1 %v1086_v40 }
  0x92   :  { %666 = vmatprep.subr.bf16.mxu1 %v1087_v41 }
  0x95   :  { %667 = vmatpush1.bf16.msra.mxu1 %v1092_v44 }
  0x96   :  { %668 = vmatprep.subr.bf16.mxu1 %v1093_v45 }
  0x99   :  { %669 = vmatpush1.bf16.msra.mxu1 %v1098_v48 }
  0x9a   :  { %670 = vmatprep.subr.bf16.mxu1 %v1099_v49 }
 0x151   :  { %v1267_v51 = vpop.f32.mrb[0].mxu0 }
 0x152   :  { %v224_v52 = vpop.f32.mrb[1].mxu0  ;;  %v246_v54 = vmul.f32 %v1267_v51, %v1267_v51 }
 0x153   :  { %v1269_v53 = vpop.f32.mrb[2].mxu0  ;;  %v1101_v52 = vld [vmem:[%s1573_s4 + $0x120] ss:$8 sps:$4 sm:$0xff]  }
 0x154   :  { %v237_v55 = vadd.f32 %v1269_v53, %v1267_v51  ;;  %v247_v56 = vmul.f32 %v1269_v53, %v1269_v53  ;;  %v227_v57 = vpop.f32.mrb[3].mxu0  ;;  %708 = vmatpush1.bf16.msra.mxu0 %v1101_v52 }
 0x155   :  { %v1107_v57 = vld [vmem:[%s1573_s4 + $0x130] ss:$8 sps:$4 sm:$0xff]  }
 0x156   :  { %v250_v58 = vadd.f32 %v247_v56, %v246_v54  ;;  %v1104_v54 = vld [vmem:[%s1573_s4 + $0xa0] ss:$8 sps:$4 sm:$0xff]   ;;  %v1109_v56 = vld [vmem:[%s1573_s4 + $0x134] ss:$8 sps:$4 sm:$0xff]  }
 0x157   :  { %671 = vmatpush1.bf16.msra.mxu1 %v1104_v54  ;;  %709 = vmatprep.subr.bf16.mxu0 %v1109_v56 }
 0x158   :  { %710 = vmatpush1.bf16.msra.mxu0 %v1107_v57 }
 0x159   :  { %v1277_v59 = vpop.f32.mrb[4].mxu0 }
 0x15a   :  { %v238_v60 = vadd.f32 %v237_v55, %v1277_v59  ;;  %v248_v61 = vmul.f32 %v1277_v59, %v1277_v59  ;;  %v232_v62 = vpop.f32.mrb[5].mxu0  ;;  %v1105_v55 = vld [vmem:[%s1573_s4 + $0xb4] ss:$8 sps:$4 sm:$0xff]  }
 0x15b   :  { %v1282_v63 = vpop.f32.mrb[6].mxu0  ;;  %672 = vmatprep.subr.bf16.mxu1 %v1105_v55  ;;  %v1113_v62 = vld [vmem:[%s1573_s4 + $0x140] ss:$8 sps:$4 sm:$0xff]  }
 0x15c   :  { %v251_v0 = vadd.f32 %v250_v58, %v248_v61  ;;  %v239_v1 = vadd.f32 %v238_v60, %v1282_v63  ;;  %v249_v3 = vmul.f32 %v1282_v63, %v1282_v63  ;;  %v235_v4 = vpop.f32.mrb[7].mxu0  ;;  %v1110_v58 = vld [vmem:[%s1573_s4 + $0xb0] ss:$8 sps:$4 sm:$0xff]   ;;  %v1111_v60 = vld [vmem:[%s1573_s4 + $0xc4] ss:$8 sps:$4 sm:$0xff]  }
 0x15d   :  { %673 = vmatpush1.bf16.msra.mxu1 %v1110_v58  ;;  %v1115_v61 = vld [vmem:[%s1573_s4 + $0x144] ss:$8 sps:$4 sm:$0xff]   ;;  %v1119_v4 = vld [vmem:[%s1573_s4 + $0x150] ss:$8 sps:$4 sm:$0xff]  }
 0x15e   :  { %v240_v5 = vrot.slane %v239_v1, 4  ;;  %v252_v6 = vadd.f32 %v251_v0, %v249_v3  ;;  %v1116_v0 = vld [vmem:[%s1573_s4 + $0xc0] ss:$8 sps:$4 sm:$0xff]   ;;  %674 = vmatprep.subr.bf16.mxu1 %v1111_v60  ;;  %711 = vmatprep.subr.bf16.mxu0 %v1115_v61  ;;  %v1121_v3 = vld [vmem:[%s1573_s4 + $0x154] ss:$8 sps:$4 sm:$0xff]  }
 0x15f   :  { %712 = vmatpush1.bf16.msra.mxu0 %v1113_v62 }
 0x160   :  { %v241_v7 = vadd.f32 %v240_v5, %v239_v1  ;;  %v253_v8 = vrot.slane %v252_v6, 4  ;;  %v1117_v1 = vld [vmem:[%s1573_s4 + $0xd4] ss:$8 sps:$4 sm:$0xff]   ;;  %v1122_v5 = vld [vmem:[%s1573_s4 + $0xd0] ss:$8 sps:$4 sm:$0xff]   ;;  %713 = vmatprep.subr.bf16.mxu0 %v1121_v3 }
 0x161   :  { %675 = vmatpush1.bf16.msra.mxu1 %v1116_v0 }
 0x162   :  { %v242_v9 = vrot.slane %v241_v7, 2  ;;  %v254_v10 = vadd.f32 %v253_v8, %v252_v6  ;;  %676 = vmatprep.subr.bf16.mxu1 %v1117_v1  ;;  %v1123_v6 = vld [vmem:[%s1573_s4 + $0xe4] ss:$8 sps:$4 sm:$0xff]  }
 0x163   :  { %714 = vmatpush1.bf16.msra.mxu0 %v1119_v4  ;;  %v1127_v8 = vld [vmem:[%s1573_s4 + $0x164] ss:$8 sps:$4 sm:$0xff]  }
 0x164   :  { %v243_v11 = vadd.f32 %v242_v9, %v241_v7  ;;  %v255_v12 = vrot.slane %v254_v10, 2  ;;  %v1125_v7 = vld [vmem:[%s1573_s4 + $0x160] ss:$8 sps:$4 sm:$0xff]   ;;  %715 = vmatprep.subr.bf16.mxu0 %v1127_v8 }
 0x165   :  { %677 = vmatpush1.bf16.msra.mxu1 %v1122_v5  ;;  %v1128_v9 = vld [vmem:[%s1573_s4 + $0xe0] ss:$8 sps:$4 sm:$0xff]  }
 0x166   :  { %v244_v13 = vrot.slane %v243_v11, 1  ;;  %v256_v14 = vadd.f32 %v255_v12, %v254_v10  ;;  %v1129_v10 = vld [vmem:[%s1573_s4 + $0xf4] ss:$8 sps:$4 sm:$0xff]   ;;  %678 = vmatprep.subr.bf16.mxu1 %v1123_v6  ;;  %v1131_v12 = vld [vmem:[%s1573_s4 + $0x170] ss:$8 sps:$4 sm:$0xff]  }
 0x167   :  { %716 = vmatpush1.bf16.msra.mxu0 %v1125_v7 }
 0x168   :  { %v257_v15 = vrot.slane %v256_v14, 1  ;;  %v245_v16 = vadd.f32 %v244_v13, %v243_v11  ;;  %v1133_v11 = vld [vmem:[%s1573_s4 + $0x174] ss:$8 sps:$4 sm:$0xff]   ;;  %v1134_v13 = vld [vmem:[%s1573_s4 + $0xf0] ss:$8 sps:$4 sm:$0xff]  }
 0x169   :  { %679 = vmatpush1.bf16.msra.mxu1 %v1128_v9  ;;  %717 = vmatprep.subr.bf16.mxu0 %v1133_v11 }
 0x16a   :  { %v258_v17 = vadd.f32 %v257_v15, %v256_v14  ;;  %680 = vmatprep.subr.bf16.mxu1 %v1129_v10 }
 0x16b   :  { %718 = vmatpush1.bf16.msra.mxu0 %v1131_v12 }
 0x16c   :  { %v259_v18 = vsel %vm39_vm1, %v245_v16, %v258_v17 }
 0x16d   :  { %260 = vrot.lane.b32.xlu1 %v259_v18, %s1141_s1  ;;  %681 = vmatpush1.bf16.msra.mxu1 %v1134_v13 }
 0x1df   :  { %v261_v19 = vpop.permute.xlu1 %260 }
 0x1e0   :  { %v262_v20 = vadd.f32 %v261_v19, %v259_v18 }
 0x1e2   :  { %263 = vrot.lane.b32.xlu1 %v262_v20, %s1142_s29 }
 0x254   :  { %v264_v28 = vpop.permute.xlu1 %263 }
 0x255   :  { %v265_v29 = vadd.f32 %v264_v28, %v262_v20 }
 0x257   :  { %266 = vrot.lane.b32.xlu0 %v265_v29, %s1143_s23 }
 0x2c9   :  { %v267_v37 = vpop.permute.xlu0 %266 }
 0x2ca   :  { %v1335_v39 = vadd.f32 %v267_v37, %v265_v29 }
 0x2cc   :  { %269 = vrot.lane.b32.xlu1 %v1335_v39, %s1140_s0 }
 0x33e   :  { %v270_v14 = vpop.permute.xlu1 %269 }
 0x33f   :  { %v271_v15 = vadd.f32 %v270_v14, %v1335_v39 }
 0x341   :  { %v273_v16 = vmul.f32 0.001953125, %v271_v15 }
 0x343   :  { %v274_v17 = vmul.f32 %v273_v16, %v273_v16 }
 0x345   :  { %v276_v18 = vrot.slane %v274_v17, 7 }
 0x347   :  { %v278_v19 = vsub.f32 %v273_v16, %v276_v18 }
 0x349   :  { %v279_v20 = vmax.f32 %v278_v19, 0.0 }
 0x34b   :  { %v281_v21 = vadd.f32 1e-05, %v279_v20 }
 0x34d   :  { %1135 = vrsqrt.f32 %v281_v21 }
 0x357   :  { %v1136_v28 = vpop.eup %1135 }
 0x358   :  { %v290_v29 = vrot.slane %v1136_v28, %v1443_v27 }
 0x35a   :  { %v291_v30 = vcombine.high %v290_v29, %v290_v29 }
 0x35c   :  { %v298_v33 = vrot.slane %v291_v30, %v1443_v27 }
 0x35e   :  { %v300_v34 = vmul.f32 %v298_v33, %v280_v31 }
 0x360   :  { %v302_v36 = vmul.f32 %v300_v34, %v273_v16  ;;  %v308_v37 = vrot.slane %v300_v34, %v1450_v32 }
 0x362   :  { %v303_v38 = vsub.f32 %v301_v35, %v302_v36  ;;  %v310_v39 = vmul.f32 %v308_v37, %v1267_v51  ;;  %v311_v41 = vmul.f32 %v308_v37, %v1269_v53  ;;  %v312_v42 = vmul.f32 %v308_v37, %v1277_v59 }
 0x363   :  { %v313_v43 = vmul.f32 %v308_v37, %v1282_v63 }
 0x364   :  { %v318_v40 = vrot.slane %v303_v38, %v1450_v32 }
 0x366   :  { %v320_v44 = vadd.f32 %v318_v40, %v310_v39  ;;  %v321_v45 = vadd.f32 %v318_v40, %v311_v41  ;;  %v322_v46 = vadd.f32 %v318_v40, %v312_v42  ;;  %v323_v47 = vadd.f32 %v318_v40, %v313_v43 }
 0x368   :  { %v324_v48 = vmax.f32 %v320_v44, 0.0  ;;  %v325_v49 = vmax.f32 %v321_v45, 0.0  ;;  %v326_v50 = vmax.f32 %v322_v46, 0.0  ;;  %v327_v52 = vmax.f32 %v323_v47, 0.0 }
 0x36a   :  { %v332_v54 = vrot.slane %v324_v48, 7  ;;  %v333_v51 = vrot.slane %v325_v49, 7  ;;  %v344_v55 = vrot.slane %v324_v48, 1  ;;  %v345_v56 = vrot.slane %v325_v49, 1 }
 0x36b   :  { %v357_v57 = vpack.c.bf16 %v325_v49, %v324_v48  ;;  %v360_v59 = vpack.c.bf16 %v327_v52, %v326_v50  ;;  %v335_v63 = vrot.slane %v326_v50, 7  ;;  %v336_v58 = vrot.slane %v327_v52, 7 }
 0x36c   :  { %v346_v60 = vsel %vm52_vm0, %v344_v55, %v345_v56  ;;  %v334_v61 = vsel %vm39_vm1, %v332_v54, %v333_v51  ;;  %v347_v62 = vrot.slane %v326_v50, 1  ;;  %v348_v0 = vrot.slane %v327_v52, 1 }
 0x36d   :  { %682 = vmatprep.mubr.bf16.mxu1 %v357_v57  ;;  %v1012_v1 = vpack.c.bf16 %v345_v56, %v346_v60  ;;  %v1005_v3 = vpack.c.bf16 %v334_v61, %v332_v54  ;;  %v337_v4 = vsel %vm39_vm1, %v335_v63, %v336_v58 }
 0x36e   :  { %v1009_v5 = vpack.c.bf16 %v337_v4, %v335_v63  ;;  %v349_v6 = vsel %vm52_vm0, %v347_v62, %v348_v0 }
 0x36f   :  { %1006 = vmatmul.mubr.msk.bf16.vlgmr.msra.gmra.mrb[0].mxu1 %vm1463_vm5, %v1005_v3  ;;  %1013 = vmatmul.mubr.msk.bf16.vlgmr.msra.gmra.mrb[8].mxu0 %vm1011_vm6, %v1012_v1  ;;  %v1015_v7 = vpack.c.bf16 %v348_v0, %v349_v6 }
 0x370   :  { %692 = vmatprep.mubr.bf16.mxu1 %v360_v59  ;;  %745 = vmatprep.mubr.bf16.mxu0 %v1139_v2 }
 0x377   :  { %1010 = vmatmul.mubr.msk.bf16.gmra.mrb[4].mxu1 %vm1463_vm5, %v1009_v5  ;;  %1016 = vmatmul.mubr.msk.bf16.gmra.mrb[12].mxu0 %vm1011_vm6, %v1015_v7 }
 0x442   :  { %v684_v8 = vpop.f32.mrb[0].mxu1  ;;  %v737_v9 = vpop.f32.mrb[8].mxu0 }
 0x443   :  { %v1477_v10 = vadd.f32 %v737_v9, %v684_v8  ;;  %v686_v11 = vpop.f32.mrb[1].mxu1  ;;  %v739_v12 = vpop.f32.mrb[9].mxu0 }
 0x444   :  { %v1479_v13 = vadd.f32 %v739_v12, %v686_v11  ;;  %v688_v14 = vpop.f32.mrb[2].mxu1  ;;  %v741_v15 = vpop.f32.mrb[10].mxu0 }
 0x445   :  { %v1481_v16 = vadd.f32 %v741_v15, %v688_v14  ;;  %v690_v17 = vpop.f32.mrb[3].mxu1  ;;  %v743_v18 = vpop.f32.mrb[11].mxu0  ;;  %v774_v23 = vmul.f32 %v1477_v10, %v1477_v10 }
 0x446   :  { %v1483_v19 = vadd.f32 %v743_v18, %v690_v17  ;;  %v775_v31 = vmul.f32 %v1479_v13, %v1479_v13 }
 0x447   :  { %v776_v2 = vmul.f32 %v1481_v16, %v1481_v16  ;;  %v756_v25 = vadd.f32 %v1481_v16, %v1477_v10 }
 0x448   :  { %v777_v20 = vmul.f32 %v1483_v19, %v1483_v19  ;;  %v765_v33 = vadd.f32 %v1483_v19, %v1479_v13 }
 0x449   :  { %v782_v37 = vadd.f32 %v776_v2, %v774_v23 }
 0x44a   :  { %v694_v21 = vpop.f32.mrb[4].mxu1  ;;  %v747_v22 = vpop.f32.mrb[12].mxu0  ;;  %v791_v43 = vadd.f32 %v777_v20, %v775_v31 }
 0x44b   :  { %v1493_v28 = vadd.f32 %v747_v22, %v694_v21  ;;  %v696_v29 = vpop.f32.mrb[5].mxu1  ;;  %v749_v30 = vpop.f32.mrb[13].mxu0  ;;  %v807_v21 = vand.u32 127, %v287_v24 }
 0x44c   :  { %v1499_v34 = vadd.f32 %v749_v30, %v696_v29  ;;  %v698_v35 = vpop.f32.mrb[6].mxu1  ;;  %v751_v36 = vpop.f32.mrb[14].mxu0 }
 0x44d   :  { %v757_v38 = vadd.f32 %v756_v25, %v1493_v28  ;;  %v778_v39 = vmul.f32 %v1493_v28, %v1493_v28  ;;  %v1504_v40 = vadd.f32 %v751_v36, %v698_v35  ;;  %v700_v41 = vpop.f32.mrb[7].mxu1  ;;  %v753_v42 = vpop.f32.mrb[15].mxu0  ;;  %vm808_vm7 = vcmp.lt.s32.totalorder %v807_v21, 16 }
 0x44e   :  { %v766_v44 = vadd.f32 %v765_v33, %v1499_v34  ;;  %v779_v45 = vmul.f32 %v1499_v34, %v1499_v34  ;;  %v1509_v46 = vadd.f32 %v753_v42, %v700_v41  ;;  %vm817_vm8 = vcmp.lt.s32.totalorder %v807_v21, 32 }
 0x44f   :  { %v783_v47 = vadd.f32 %v782_v37, %v778_v39  ;;  %v758_v48 = vadd.f32 %v757_v38, %v1504_v40  ;;  %v780_v49 = vmul.f32 %v1504_v40, %v1504_v40  ;;  %vm826_vm9 = vcmp.lt.s32.totalorder %v807_v21, 64 }
 0x450   :  { %v792_v50 = vadd.f32 %v791_v43, %v779_v45  ;;  %v767_v52 = vadd.f32 %v766_v44, %v1509_v46  ;;  %v781_v54 = vmul.f32 %v1509_v46, %v1509_v46 }
 0x451   :  { %v759_v51 = vrot.slane %v758_v48, 4  ;;  %v784_v55 = vadd.f32 %v783_v47, %v780_v49 }
 0x452   :  { %v768_v56 = vrot.slane %v767_v52, 4  ;;  %v793_v57 = vadd.f32 %v792_v50, %v781_v54 }
 0x453   :  { %v760_v53 = vadd.f32 %v759_v51, %v758_v48  ;;  %v785_v59 = vrot.slane %v784_v55, 4 }
 0x454   :  { %v769_v63 = vadd.f32 %v768_v56, %v767_v52  ;;  %v794_v58 = vrot.slane %v793_v57, 4 }
 0x455   :  { %v761_v60 = vrot.slane %v760_v53, 2  ;;  %v786_v61 = vadd.f32 %v785_v59, %v784_v55  ;;  %v839_v59 = vld [vmem:[%s1576_s5] sm:$0x3] }
 0x456   :  { %v770_v62 = vrot.slane %v769_v63, 2  ;;  %v795_v0 = vadd.f32 %v794_v58, %v793_v57 }
 0x457   :  { %v762_v1 = vadd.f32 %v761_v60, %v760_v53  ;;  %v787_v3 = vrot.slane %v786_v61, 2 }
 0x458   :  { %v771_v4 = vadd.f32 %v770_v62, %v769_v63  ;;  %v796_v5 = vrot.slane %v795_v0, 2  ;;  %v869_v63 = vsub.s32 1, %v1440_v26 }
 0x459   :  { %v763_v6 = vrot.slane %v762_v1, 1  ;;  %v788_v7 = vadd.f32 %v787_v3, %v786_v61 }
 0x45a   :  { %v772_v8 = vrot.slane %v771_v4, 1  ;;  %v797_v9 = vadd.f32 %v796_v5, %v795_v0  ;;  %v861_v5 = vld [vmem:[%s1577_s6] sm:$0x3] }
 0x45b   :  { %v789_v11 = vrot.slane %v788_v7, 1  ;;  %v764_v14 = vadd.f32 %v763_v6, %v762_v1 }
 0x45c   :  { %v798_v12 = vrot.slane %v797_v9, 1  ;;  %v773_v17 = vadd.f32 %v772_v8, %v771_v4 }
 0x45d   :  { %v790_v15 = vadd.f32 %v789_v11, %v788_v7 }
 0x45e   :  { %v799_v18 = vadd.f32 %v798_v12, %v797_v9 }
 0x45f   :  { %v800_v2 = vsel %vm39_vm1, %v764_v14, %v790_v15 }
 0x460   :  { %802 = vrot.lane.b32.xlu0 %v800_v2, %s1142_s29  ;;  %v801_v20 = vsel %vm39_vm1, %v773_v17, %v799_v18 }
 0x461   :  { %804 = vrot.lane.b32.xlu1 %v801_v20, %s1142_s29 }
 0x4d2   :  { %v803_v22 = vpop.permute.xlu0 %802 }
 0x4d3   :  { %v805_v23 = vpop.permute.xlu1 %804 }
 0x4d4   :  { %v809_v25 = vsel %vm808_vm7, %v803_v22, %v805_v23  ;;  %v810_v29 = vsel %vm808_vm7, %v805_v23, %v803_v22 }
 0x4d5   :  { %v811_v30 = vadd.f32 %v810_v29, %v800_v2  ;;  %v812_v31 = vadd.f32 %v809_v25, %v801_v20 }
 0x4d7   :  { %813 = vrot.lane.b32.xlu0 %v811_v30, %s1143_s23  ;;  %815 = vrot.lane.b32.xlu1 %v812_v31, %s1143_s23 }
 0x549   :  { %v814_v33 = vpop.permute.xlu0 %813  ;;  %v816_v35 = vpop.permute.xlu1 %815 }
 0x54a   :  { %v818_v36 = vsel %vm817_vm8, %v814_v33, %v816_v35  ;;  %v819_v37 = vsel %vm817_vm8, %v816_v35, %v814_v33 }
 0x54b   :  { %v820_v38 = vadd.f32 %v819_v37, %v811_v30  ;;  %v821_v39 = vadd.f32 %v818_v36, %v812_v31 }
 0x54d   :  { %822 = vrot.lane.b32.xlu0 %v820_v38, %s1140_s0  ;;  %824 = vrot.lane.b32.xlu1 %v821_v39, %s1140_s0 }
 0x5bf   :  { %v823_v24 = vpop.permute.xlu0 %822  ;;  %v825_v41 = vpop.permute.xlu1 %824 }
 0x5c0   :  { %v827_v42 = vsel %vm826_vm9, %v823_v24, %v825_v41  ;;  %v828_v43 = vsel %vm826_vm9, %v825_v41, %v823_v24 }
 0x5c1   :  { %v829_v44 = vadd.f32 %v828_v43, %v820_v38  ;;  %v830_v45 = vadd.f32 %v827_v42, %v821_v39 }
 0x5c3   :  { %v831_v47 = vadd.f32 %v830_v45, %v829_v44 }
 0x5c5   :  { %v832_v48 = vmul.f32 0.001953125, %v831_v47 }
 0x5c7   :  { %v833_v49 = vmul.f32 %v832_v48, %v832_v48 }
 0x5c9   :  { %v835_v50 = vrot.slane %v833_v49, 7 }
 0x5cb   :  { %v837_v52 = vsub.f32 %v832_v48, %v835_v50 }
 0x5cd   :  { %v838_v54 = vmax.f32 %v837_v52, 0.0 }
 0x5cf   :  { %v840_v51 = vadd.f32 1e-05, %v838_v54 }
 0x5d1   :  { %1137 = vrsqrt.f32 %v840_v51 }
 0x5db   :  { %v1138_v55 = vpop.eup %1137 }
 0x5dc   :  { %v843_v56 = vcombine.low %v1138_v55, %v1138_v55 }
 0x5de   :  { %v850_v57 = vrot.slane %v843_v56, %v1443_v27 }
 0x5e0   :  { %v851_v53 = vcombine.high %v850_v57, %v850_v57 }
 0x5e2   :  { %v858_v58 = vrot.slane %v851_v53, %v1443_v27 }
 0x5e4   :  { %v860_v60 = vmul.f32 %v858_v58, %v839_v59 }
 0x5e6   :  { %v866_v61 = vrot.slane %v860_v60, %v1450_v32  ;;  %v870_v62 = vrot.slane %v860_v60, %v869_v63 }
 0x5e8   :  { %v873_v0 = vmul.f32 %v866_v61, %v832_v48  ;;  %v874_v1 = vmul.f32 %v870_v62, %v832_v48  ;;  %v894_v26 = vmul.f32 %v866_v61, %v1477_v10  ;;  %v895_v8 = vmul.f32 %v870_v62, %v1479_v13 }
 0x5e9   :  { %v896_v9 = vmul.f32 %v866_v61, %v1481_v16  ;;  %v897_v11 = vmul.f32 %v870_v62, %v1483_v19  ;;  %v898_v15 = vmul.f32 %v866_v61, %v1493_v28  ;;  %v899_v17 = vmul.f32 %v870_v62, %v1499_v34 }
 0x5ea   :  { %v877_v3 = vcombine.low %v873_v0, %v874_v1  ;;  %v900_v18 = vmul.f32 %v866_v61, %v1504_v40 }
 0x5ec   :  { %v884_v4 = vrot.slane %v877_v3, %v1443_v27 }
 0x5ee   :  { %v891_v6 = vrot.slane %v884_v4, %v1443_v27  ;;  %v901_v27 = vmul.f32 %v870_v62, %v1509_v46 }
 0x5f0   :  { %v893_v7 = vsub.f32 %v861_v5, %v891_v6 }
 0x5f2   :  { %v906_v12 = vrot.slane %v893_v7, %v1450_v32  ;;  %v910_v14 = vrot.slane %v893_v7, %v869_v63 }
 0x5f4   :  { %v913_v2 = vadd.f32 %v906_v12, %v894_v26  ;;  %v914_v20 = vadd.f32 %v910_v14, %v895_v8  ;;  %v915_v10 = vadd.f32 %v906_v12, %v896_v9  ;;  %v916_v21 = vadd.f32 %v910_v14, %v897_v11 }
 0x5f5   :  { %v917_v13 = vadd.f32 %v906_v12, %v898_v15  ;;  %v918_v22 = vadd.f32 %v910_v14, %v899_v17  ;;  %v919_v16 = vadd.f32 %v906_v12, %v900_v18  ;;  %v920_v23 = vadd.f32 %v910_v14, %v901_v27 }
 0x5f6   :  { %v921_v19 = vmax.f32 %v913_v2, 0.0  ;;  %v922_v25 = vmax.f32 %v914_v20, 0.0  ;;  %v923_v32 = vmax.f32 %v915_v10, 0.0  ;;  %v924_v29 = vmax.f32 %v916_v21, 0.0 }
 0x5f7   :  { %v925_v30 = vmax.f32 %v917_v13, 0.0  ;;  %v926_v28 = vmax.f32 %v918_v22, 0.0  ;;  %v927_v31 = vmax.f32 %v919_v16, 0.0  ;;  %v928_v34 = vmax.f32 %v920_v23, 0.0 }
 0x5f8   :  { %929 = vst [vmem:[%s1578_s7] sm:$0xff] %v921_v19  ;;  %930 = vst [vmem:[%s1578_s7 + $0x8] sm:$0xff] %v922_v25 }
 0x5f9   :  { %931 = vst [vmem:[%s1578_s7 + $0x10] sm:$0xff] %v923_v32  ;;  %932 = vst [vmem:[%s1578_s7 + $0x18] sm:$0xff] %v924_v29 }
 0x5fa   :  { %933 = vst [vmem:[%s1578_s7 + $0x20] sm:$0xff] %v925_v30  ;;  %934 = vst [vmem:[%s1578_s7 + $0x28] sm:$0xff] %v926_v28 }
 0x5fb   :  { %935 = vst [vmem:[%s1578_s7 + $0x30] sm:$0xff] %v927_v31  ;;  %936 = vst [vmem:[%s1578_s7 + $0x38] sm:$0xff] %v928_v34 }

</bundles_post_ra>
